<compile_context>
chip_gen: v6e
topology: v6e:2x2x1
jax: 0.10.0
libtpu: 0.0.40
codegen_flags: <defaults>
</compile_context>

<pallas_src>
import jax
import jax.numpy as jnp
from jax.experimental import pallas as pl
from jax.experimental.pallas import tpu as pltpu

# ----------------------------- configuration --------------------------------
B = 16           # batch (number of variants scored in one forward)
L = 8            # sequence length
H = 32           # hidden size
A = 4            # aux-feature dim per position
VOCAB = 16       # full token vocab of the synthetic tokenizer
VOCAB_START = 5  # tokenizer.nucleotide_token_id_start()
VOCAB_END = 9    # tokenizer.nucleotide_token_id_end()
V_NUC = VOCAB_END - VOCAB_START   # 4 nucleotides (A, C, G, T)
V_PAD = 128                       # nucleotide slice padded to one lane register
F_BIAS = H + A                    # bias lane index inside the feature vector
F1 = F_BIAS + 1                   # real feature width: [emb | aux | 1]
F_PAD = 128                       # feature dim zero-padded to one lane register

VB = 8                            # batch items per grid step -> 4*VB*L = 256 MXU rows
NUM_TILES = -(-B // VB)           # grid length (ceil)
B_PAD = NUM_TILES * VB            # batch padded to a whole number of tiles
TR = VB * L                       # rows per {section} per tile (sublane-aligned)
R2 = 2 * TR                       # rows per {ref|alt} half per tile
NEG_BIG = -1e30                   # padded-vocab mask, baked into the bias row


# ------------------------------- Pallas kernel ------------------------------
def vep_kernel(x_ref, w_ref, sel_ref, out_ref):
    """One batch-tile of fused ref/alt x fwd/rev VEP scores.

    x_ref   : (4, TR, F_PAD) bf16  sections [ref_fwd | ref_rev | alt_fwd | alt_rev]
    w_ref   : (F_PAD, V_PAD) bf16  folded head; bias + (-1e30) vocab mask in row F_BIAS
    sel_ref : (R2, V_PAD) f32      one-hot local-batch selection, 0.5/(L-1) folded in
    out_ref : (8, V_PAD) f32       per-tile scores in lanes 0..VB-1 (8 identical rows)
    """
    x = x_ref[...].reshape(4 * TR, F_PAD)          # leading-dim collapse, layout no-op

    # One bf16 MXU pass for all four log-odds evaluations (bias folded into W).
    logits = jnp.dot(x, w_ref[...], preferred_element_type=jnp.float32)  # (4TR, V_PAD)

    # Stable log-odds: log(p/(1-p)) = z - log(sum_exp - exp(z)).
    # Padded vocab lanes carry -1e30 from the bias row -> exp underflows to 0,
    # their log-odds are identical for ref/alt, so they never affect the max.
    m = jnp.max(logits, axis=1, keepdims=True)
    z = logits - m
    e = jnp.exp(z)
    s = jnp.sum(e, axis=1, keepdims=True)
    log_odds = z - jnp.log(s - e)

    # |log_odds_ref - log_odds_alt|; rows 0..TR-1 = fwd, TR..R2-1 = rev.
    # Dropped-position rows were zeroed host-side for both ref and alt -> d = 0.
    d = jnp.abs(log_odds[:R2] - log_odds[R2:])                       # (R2, V_PAD)
    dmax = jnp.max(d, axis=1, keepdims=True)                         # (R2, 1)

    # Scatter per-row maxima onto the local-batch lanes (scale folded into sel),
    # then reduce over rows on the MXU with a ones block -> lane-dense output.
    contrib = sel_ref[...] * dmax                                    # (R2, V_PAD)
    ones = jnp.ones((8, R2), jnp.float32)
    out_ref[...] = jnp.dot(ones, contrib, preferred_element_type=jnp.float32)


# --------------------------------- wrapper -----------------------------------
def vep_score_fused(x_all, w_eff, sel):
    out = pl.pallas_call(
        vep_kernel,
        out_shape=jax.ShapeDtypeStruct((NUM_TILES * 8, V_PAD), jnp.float32),
        grid_spec=pltpu.PrefetchScalarGridSpec(
            num_scalar_prefetch=0,
            grid=(NUM_TILES,),
            in_specs=[
                pl.BlockSpec((4, TR, F_PAD), lambda i: (0, i, 0)),   # streamed x tile
                pl.BlockSpec((F_PAD, V_PAD), lambda i: (0, 0)),      # resident weights
                pl.BlockSpec((R2, V_PAD), lambda i: (0, 0)),         # resident selector
            ],
            out_specs=pl.BlockSpec((8, V_PAD), lambda i: (i, 0)),
        ),
        compiler_params=pltpu.CompilerParams(
            dimension_semantics=("parallel",)),
    )(x_all, w_eff, sel)
    # lane-dense per-tile rows -> (B,) scores
    return out.reshape(NUM_TILES, 8, V_PAD)[:, 0, :VB].reshape(-1)[:B]


# ----------------------------- glue (plain JAX) ------------------------------
def init_params(key):
    k1, k2, k3, k4 = jax.random.split(key, 4)
    embed = 0.1 * jax.random.normal(k1, (VOCAB, H), jnp.float32)
    w_aux = 0.1 * jax.random.normal(k2, (A, H), jnp.float32)
    w_out_full = 0.1 * jax.random.normal(k3, (H, VOCAB), jnp.float32)
    b_out_full = 0.1 * jax.random.normal(k4, (VOCAB,), jnp.float32)

    w_out_nuc = w_out_full[:, VOCAB_START:VOCAB_END]        # (H, V_NUC)
    b_nuc = b_out_full[VOCAB_START:VOCAB_END]               # (V_NUC,)

    # Fold aux projection AND bias into one output projection: x=[emb|aux|1] @ W_eff.
    w_eff = jnp.zeros((F_PAD, V_PAD), jnp.float32)
    w_eff = w_eff.at[:H, :V_NUC].set(w_out_nuc)
    w_eff = w_eff.at[H:H + A, :V_NUC].set(w_aux @ w_out_nuc)
    bias_row = jnp.full((V_PAD,), NEG_BIG, jnp.float32).at[:V_NUC].set(b_nuc)
    w_eff = w_eff.at[F_BIAS, :].set(bias_row)                # bias + vocab-pad mask

    return dict(embed=embed, w_aux=w_aux, w_out_nuc=w_out_nuc, b_nuc=b_nuc,
                w_eff=w_eff.astype(jnp.bfloat16))


def vep_influence_forward(params,
                          input_ids_ref_fwd, aux_features_ref_fwd,
                          input_ids_alt_fwd, aux_features_alt_fwd, pos_fwd,
                          input_ids_ref_rev, aux_features_ref_rev,
                          input_ids_alt_rev, aux_features_alt_rev, pos_rev):
    embed = params["embed"]

    ids_all = jnp.stack([input_ids_ref_fwd, input_ids_ref_rev,
                         input_ids_alt_fwd, input_ids_alt_rev])          # (4, B, L)
    aux_all = jnp.stack([aux_features_ref_fwd, aux_features_ref_rev,
                         aux_features_alt_fwd, aux_features_alt_rev])    # (4, B, L, A)
    pf = jnp.asarray(pos_fwd, dtype=jnp.int32)
    pr = jnp.asarray(pos_rev, dtype=jnp.int32)
    pos_all = jnp.stack([pf, pr, pf, pr])                                # (4,)

    # One pass: [emb | aux | 1] features for all four sections.
    feat = jnp.concatenate([
        embed[ids_all],                                  # (4, B, L, H)  gather -> XLA
        aux_all.astype(jnp.float32),                     # (4, B, L, A)
        jnp.ones((4, B, L, 1), jnp.float32),             # bias lane (row F_BIAS of W_eff)
    ], axis=-1)                                          # (4, B, L, F1)

    # Drop the masked position host-side: zeroed rows are identical for ref and
    # alt, so |log_odds_ref - log_odds_alt| is exactly 0 there.
    keep = jnp.arange(L)[None, None, :, None] != pos_all[:, None, None, None]
    feat = jnp.where(keep, feat, 0.0)

    # Pad feature lanes -> F_PAD, batch -> B_PAD; single bf16 slab for the kernel.
    feat = jnp.pad(feat, ((0, 0), (0, B_PAD - B), (0, 0), (0, F_PAD - F1)))
    x_all = feat.reshape(4, B_PAD * L, F_PAD).astype(jnp.bfloat16)

    # One-hot local-batch selection constant (scatter to lanes + 0.5/(L-1) scale).
    r = jnp.arange(R2)
    local_b = (r % TR) // L
    sel = (jnp.arange(V_PAD)[None, :] == local_b[:, None]).astype(jnp.float32)
    sel = sel * (0.5 / (L - 1))

    return vep_score_fused(x_all, params["w_eff"], sel)


# -------------------------- pure-JAX reference -------------------------------
def _remove_pos(x, pos):
    return jnp.concatenate([x[:, :pos], x[:, pos + 1:]], axis=1)


def _ref_score(params, ids_ref, aux_ref, ids_alt, aux_alt, pos):
    embed, w_aux = params["embed"], params["w_aux"]
    w, b = params["w_out_nuc"], params["b_nuc"]

    def log_odds(ids, aux):
        h = embed[ids] + jnp.einsum('bpa,ah->bph', aux, w_aux)
        logits = jnp.einsum('bph,hv->bpv', h, w) + b
        logits = _remove_pos(logits, pos)
        p = jax.nn.softmax(logits, axis=2)
        return jnp.log(p / (1.0 - p))

    d = jnp.abs(log_odds(ids_ref, aux_ref) - log_odds(ids_alt, aux_alt))
    return jnp.mean(jnp.max(d, axis=2), axis=1)


# ----------------------------------- main ------------------------------------
if __name__ == "__main__":
    key = jax.random.PRNGKey(0)
    kp, k1, k2, k3, k4, k5, k6 = jax.random.split(key, 7)
    params = init_params(kp)

    pos_fwd, pos_rev = 3, 4

    def make_pair(kid, kaux, kalt, pos):
        ids_ref = jax.random.randint(kid, (B, L), VOCAB_START, VOCAB_END)
        aux_ref = jax.random.normal(kaux, (B, L, A), jnp.float32)
        # alternate allele: change the nucleotide at `pos`
        alt_tok = VOCAB_START + (ids_ref[:, pos] - VOCAB_START + 1) % V_NUC
        ids_alt = ids_ref.at[:, pos].set(alt_tok)
        aux_alt = aux_ref + 0.01 * jax.random.normal(kalt, (B, L, A), jnp.float32)
        return ids_ref, aux_ref, ids_alt, aux_alt

    ids_rf, aux_rf, ids_af, aux_af = make_pair(k1, k2, k3, pos_fwd)
    ids_rr, aux_rr, ids_ar, aux_ar = make_pair(k4, k5, k6, pos_rev)

    fwd_fn = jax.jit(vep_influence_forward)
    out = fwd_fn(params,
                 ids_rf, aux_rf, ids_af, aux_af, pos_fwd,
                 ids_rr, aux_rr, ids_ar, aux_ar, pos_rev)
    out = jax.block_until_ready(out)

    # sanity check against a pure-JAX f32 reference (loose tol: bf16 MXU operands)
    ref = (_ref_score(params, ids_rf, aux_rf, ids_af, aux_af, pos_fwd) +
           _ref_score(params, ids_rr, aux_rr, ids_ar, aux_ar, pos_rev)) / 2
    assert out.shape == (B,)
    assert bool(jnp.all(jnp.isfinite(out)))
    assert bool(jnp.allclose(out, ref, rtol=5e-2, atol=5e-2))

    print("KERNEL_OK")
</pallas_src>

<mosaic_0001>
module attributes {stable_mosaic.version = 11 : i64} {
  func.func @vep_kernel(%arg0: i32, %arg1: memref<4x64x128xbf16, #tpu.memory_space<vmem>>, %arg2: memref<128x128xbf16, #tpu.memory_space<vmem>>, %arg3: memref<128x128xf32, #tpu.memory_space<vmem>>, %arg4: memref<8x128xf32, #tpu.memory_space<vmem>>) attributes {dimension_semantics = [#tpu.dimension_semantics<parallel>], iteration_bounds = array<i64: 2>, scalar_prefetch = 0 : i64, scratch_operands = 0 : i64, tpu.core_type = #tpu.core_type<tc>, window_params = [{transform_indices = @transform_0, window_bounds = array<i64: 4, 64, 128>}, {pipeline_mode = #tpu.pipeline_mode<synchronous>, transform_indices = @transform_1, window_bounds = array<i64: 128, 128>}, {pipeline_mode = #tpu.pipeline_mode<synchronous>, transform_indices = @transform_2, window_bounds = array<i64: 128, 128>}, {transform_indices = @transform_3, window_bounds = array<i64: 8, 128>}]} {
    %c0 = arith.constant 0 : index
    %c0_0 = arith.constant 0 : index
    %c0_1 = arith.constant 0 : index
    %0 = vector.load %arg1[%c0, %c0_0, %c0_1] : memref<4x64x128xbf16, #tpu.memory_space<vmem>>, vector<4x64x128xbf16>
    %1 = vector.shape_cast %0 : vector<4x64x128xbf16> to vector<256x128xbf16>
    %c0_2 = arith.constant 0 : index
    %c0_3 = arith.constant 0 : index
    %2 = vector.load %arg2[%c0_2, %c0_3] : memref<128x128xbf16, #tpu.memory_space<vmem>>, vector<128x128xbf16>
    %cst = arith.constant dense<0.000000e+00> : vector<256x128xf32>
    %3 = tpu.matmul %1, %2, %cst {dimension_numbers = #tpu.dot_dimension_numbers<[1], [0], [0], [1], [0, 0, 1, 1], [], []>} : vector<256x128xbf16>, vector<128x128xbf16>, vector<256x128xf32> -> vector<256x128xf32>
    %cst_4 = arith.constant dense<0xFF800000> : vector<256xf32>
    %4 = vector.multi_reduction <maximumf>, %3, %cst_4 [1] : vector<256x128xf32> to vector<256xf32>
    %5 = vector.shape_cast %4 : vector<256xf32> to vector<256x1xf32>
    %6 = vector.broadcast %5 : vector<256x1xf32> to vector<256x128xf32>
    %7 = arith.subf %3, %6 : vector<256x128xf32>
    %8 = math.exp %7 : vector<256x128xf32>
    %cst_5 = arith.constant dense<0.000000e+00> : vector<256xf32>
    %9 = vector.multi_reduction <add>, %8, %cst_5 [1] : vector<256x128xf32> to vector<256xf32>
    %10 = vector.shape_cast %9 : vector<256xf32> to vector<256x1xf32>
    %11 = vector.broadcast %10 : vector<256x1xf32> to vector<256x128xf32>
    %12 = arith.subf %11, %8 : vector<256x128xf32>
    %13 = math.log %12 : vector<256x128xf32>
    %14 = arith.subf %7, %13 : vector<256x128xf32>
    %15 = vector.extract_strided_slice %14 {offsets = [0, 0], sizes = [128, 128], strides = [1, 1]} : vector<256x128xf32> to vector<128x128xf32>
    %16 = vector.extract_strided_slice %14 {offsets = [128, 0], sizes = [128, 128], strides = [1, 1]} : vector<256x128xf32> to vector<128x128xf32>
    %17 = arith.subf %15, %16 : vector<128x128xf32>
    %18 = math.absf %17 : vector<128x128xf32>
    %cst_6 = arith.constant dense<0xFF800000> : vector<128xf32>
    %19 = vector.multi_reduction <maximumf>, %18, %cst_6 [1] : vector<128x128xf32> to vector<128xf32>
    %20 = vector.shape_cast %19 : vector<128xf32> to vector<128x1xf32>
    %c0_7 = arith.constant 0 : index
    %c0_8 = arith.constant 0 : index
    %21 = vector.load %arg3[%c0_7, %c0_8] : memref<128x128xf32, #tpu.memory_space<vmem>>, vector<128x128xf32>
    %22 = vector.broadcast %20 : vector<128x1xf32> to vector<128x128xf32>
    %23 = arith.mulf %21, %22 : vector<128x128xf32>
    %cst_9 = arith.constant 1.000000e+00 : f32
    %24 = vector.broadcast %cst_9 : f32 to vector<8x128xf32>
    %cst_10 = arith.constant dense<0.000000e+00> : vector<8x128xf32>
    %25 = tpu.matmul %24, %23, %cst_10 {dimension_numbers = #tpu.dot_dimension_numbers<[1], [0], [0], [1], [0, 0, 1, 1], [], []>} : vector<8x128xf32>, vector<128x128xf32>, vector<8x128xf32> -> vector<8x128xf32>
    %c0_11 = arith.constant 0 : index
    %c0_12 = arith.constant 0 : index
    %26 = vector.load %arg4[%c0_11, %c0_12] : memref<8x128xf32, #tpu.memory_space<vmem>>, vector<8x128xf32>
    tpu.vector_store %arg4[%c0_11, %c0_12], %25 {strides = array<i32>} : memref<8x128xf32, #tpu.memory_space<vmem>>, vector<8x128xf32>,
    return
  }
  func.func @transform_0(%arg0: i32) -> (i32, i32, i32) {
    %c0_i32 = arith.constant 0 : i32
    %c0_i32_0 = arith.constant 0 : i32
    %c0_i32_1 = arith.constant 0 : i32
    return %c0_i32, %arg0, %c0_i32_0 : i32, i32, i32
  }
  func.func @transform_1(%arg0: i32) -> (i32, i32) {
    %c0_i32 = arith.constant 0 : i32
    %c0_i32_0 = arith.constant 0 : i32
    %c0_i32_1 = arith.constant 0 : i32
    return %c0_i32, %c0_i32_0 : i32, i32
  }
  func.func @transform_2(%arg0: i32) -> (i32, i32) {
    %c0_i32 = arith.constant 0 : i32
    %c0_i32_0 = arith.constant 0 : i32
    %c0_i32_1 = arith.constant 0 : i32
    return %c0_i32, %c0_i32_0 : i32, i32
  }
  func.func @transform_3(%arg0: i32) -> (i32, i32) {
    %c0_i32 = arith.constant 0 : i32
    %c0_i32_0 = arith.constant 0 : i32
    return %arg0, %c0_i32 : i32, i32
  }
}

</mosaic_0001>

<bundles_post_ra>
// kernel: squeeze.1
= control target key start
LH: loop header
LB: loop body
LE: loop exit
PB: predicated region body
PF: predicated region fallthrough
CT: control target
= control target key end

     0   :  { %s77_s0 = inlined_call_operand.vmem [shape: f32[2,1,8], index: 0, kind: input, shape index: {}]   ;;  %s78_s1 = inlined_call_operand.hbm [shape: f32[16], index: 1, kind: output, shape index: {}]  }
   0x1   :  { %v6_v0 = vld [vmem:[%s77_s0] sm:$0x3] }
   0x2   :  { %7 = vst [vmem:[#allocation3] sm:$0x3] %v6_v0 }
   0x3   :  { %2 = vsyncpa [#allocation1], 0  ;;  %vm9_vm0 = vcmask 64512   ;;  %s59_s0 = smov 8   ;;  %vm15_vm1 = vcmask 130112   ;;  %s60_s8 = smov [#allocation0]  }
   0x4   :  { %s29_s9 = sshll.u32 %s60_s8, 4  ;;  %s30_s9 = int_to_ptr.vmem [resolvable:$true] %s29_s9 }
   0x5   :  { %s37_s10 = scalar_lea.vmem %s30_s9, 16  ;;  %s41_s11 = scalar_lea.vmem %s30_s9, 32 }
   0x6   :  { %p38_p0 = scmp.ne.s32.totalorder %s30_s9, %s37_s10  ;;  %p42_p1 = scmp.lt.s32.totalorder %s30_s9, %s30_s9 }
   0x7   :  { %p43_p2 = scmp.lt.s32.totalorder %s41_s11, %s37_s10 }
   0x9   :  { %v12_v1 = vld [vmem:[#allocation3 + $0x1] sm:$0x1]   ;;  %v8_v2 = vld [vmem:[#allocation3] sm:$0x1]   ;;  %p44_p3 = por %p43_p2, %p42_p1 }
   0xa   :  { %13 = vrot.lane.b32.xlu0 %v12_v1, %s59_s0  ;;  %10 = vst.msk [vmem:[#allocation2] sm:$0x1] %vm9_vm0, %v8_v2  }
   0xb   :  { %p45_p4 = pnand %p44_p3, %p38_p0 }
  0x7c   :  { %v14_v3 = vpop.permute.xlu0 %13  }
  0x7d   :  { %16 = vst.msk [vmem:[#allocation2] sm:$0x1] %vm15_vm1, %v14_v3  }
  0x84   :  { %v21_v4 = vld [vmem:[#allocation2] sm:$0x1] }
  0x85   :  { %24 = vst [vmem:[#allocation0] sm:$0x1] %v21_v4 }
  0x86   :  { %48 = shalt.err (!%p45_p4)
}
  0x87   :  { %32 = dma.vmem_to_hbm [thread:$0]  %s30_s9, 16, %s78_s1, [#allocation1]  }
  0x88   :  { %57 = dma.done.wait [#allocation1], 16  }
  0x89   :  { %58 = vsyncadd [#allocation1], 4294967280 }
  0x8a   :  { %34 = vsyncpa [#allocation1], 1 }

// kernel: vep_influence_forward.1
= control target key start
LH: loop header
LB: loop body
LE: loop exit
PB: predicated region body
PF: predicated region fallthrough
CT: control target
= control target key end

     0   :  { %s1673_s12 = smov 0   ;;  %s1675_s13 = smov 0   ;;  %s2208_s0 = inlined_call_operand.vmem [shape: bf16[4,128,128], index: 0, kind: input, shape index: {}]   ;;  %s2209_s1 = inlined_call_operand.vmem [shape: bf16[128,128], index: 1, kind: input, shape index: {}]   ;;  %s2210_s2 = inlined_call_operand.vmem [shape: f32[128,128], index: 2, kind: input, shape index: {}]   ;;  %s2211_s3 = inlined_call_operand.vmem [shape: f32[16,128], index: 3, kind: output, shape index: {}]  }
   0x1   :  { %s1677_s14 = smov 0  }
   0x2 LB: > { %s1270_s15 = sadd.s32 4294967295, %s1648_s14   ;;  %s1690_s16 = sadd.s32 1, %s1648_s14   ;;  %s1648_s14 = sphi %s1677_s14, %s2268_s14   ;;  %s1644_s13 = sphi %s1675_s13, %s2267_s13   ;;  %s1640_s12 = sphi %s1673_s12, %s2266_s12  }
   0x3   : > { %s17_s17 = ssub.s32 %s1648_s14, %s1690_s16  ;;  %s20_s18 = sadd.s32 1, %s1644_s13 }
   0x4   : > { %p18_p0 = scmp.eq.s32.totalorder %s17_s17, 0  ;;  %p27_p1 = scmp.ne.s32.totalorder %s1644_s13, %s1640_s12 }
   0x5   : > { %p28_p2 = scmp.eq.s32.totalorder %s1648_s14, 0  ;;  %p1273_p4 = scmp.ge.s32.totalorder %s1648_s14, 2 }
   0x6   : > { %s1699_s19 = scalar_select %p18_p0, %s1644_s13, %s20_s18  }
   0x7   : > { %p29_p3 = por %p28_p2, %p27_p1  ;;  %127 = sbr.rel (%p1273_p4) target bundleno = 24 (0x18), region = 24 }
   0xc   : > { %130 = sbr.rel (!%p29_p3) target bundleno = 24 (0x18), region = 28  ;;  %s132_s20 = sand.u32 (%p29_p3), 1, %s1644_s13  }
   0xd   : > { %s1306_s21 = sshll.u32 (%p29_p3), %s1648_s14, 5  ;;  %s1274_s22 = sshll.u32 (%p29_p3), %s132_s20, 7 }
   0xe   : > { %s1707_s25 = scalar_lea.vmem (%p29_p3), %s2208_s0, %s1306_s21  ;;  %s134_s26 = scalar_lea.vmem (%p29_p3), [#allocation2], %s1274_s22 }
   0xf   : > { %v154_v0 = vld [vmem:[%s1707_s25] sm:$0xff] (%p29_p3)   ;;  %v158_v1 = vld [vmem:[%s1707_s25 + $0x8] sm:$0xff] (%p29_p3)   ;;  %v162_v2 = vld [vmem:[%s1707_s25 + $0x10] sm:$0xff] (%p29_p3)  }
  0x10   : > { %155 = vst [vmem:[%s134_s26] sm:$0xff] (%p29_p3), %v154_v0   ;;  %159 = vst [vmem:[%s134_s26 + $0x8] sm:$0xff] (%p29_p3), %v158_v1   ;;  %v166_v3 = vld [vmem:[%s1707_s25 + $0x18] sm:$0xff] (%p29_p3)   ;;  %v170_v4 = vld [vmem:[%s1707_s25 + $0x40] sm:$0xff] (%p29_p3)  }
  0x11   : > { %163 = vst [vmem:[%s134_s26 + $0x10] sm:$0xff] %v162_v2   ;;  %v174_v5 = vld [vmem:[%s1707_s25 + $0x48] sm:$0xff]   ;;  %167 = vst [vmem:[%s134_s26 + $0x18] sm:$0xff] %v166_v3   ;;  %v178_v6 = vld [vmem:[%s1707_s25 + $0x50] sm:$0xff]  }
  0x12   : > { %171 = vst [vmem:[%s134_s26 + $0x20] sm:$0xff] %v170_v4   ;;  %175 = vst [vmem:[%s134_s26 + $0x28] sm:$0xff] %v174_v5   ;;  %v182_v7 = vld [vmem:[%s1707_s25 + $0x58] sm:$0xff]   ;;  %v186_v8 = vld [vmem:[%s1707_s25 + $0x80] sm:$0xff]  }
  0x13   : > { %179 = vst [vmem:[%s134_s26 + $0x30] sm:$0xff] %v178_v6   ;;  %183 = vst [vmem:[%s134_s26 + $0x38] sm:$0xff] %v182_v7   ;;  %v190_v9 = vld [vmem:[%s1707_s25 + $0x88] sm:$0xff]   ;;  %v194_v10 = vld [vmem:[%s1707_s25 + $0x90] sm:$0xff]  }
  0x14   : > { %187 = vst [vmem:[%s134_s26 + $0x40] sm:$0xff] %v186_v8   ;;  %v198_v11 = vld [vmem:[%s1707_s25 + $0x98] sm:$0xff]   ;;  %191 = vst [vmem:[%s134_s26 + $0x48] sm:$0xff] %v190_v9   ;;  %v202_v12 = vld [vmem:[%s1707_s25 + $0xc0] sm:$0xff]  }
  0x15   : > { %195 = vst [vmem:[%s134_s26 + $0x50] sm:$0xff] %v194_v10   ;;  %199 = vst [vmem:[%s134_s26 + $0x58] sm:$0xff] %v198_v11   ;;  %v206_v13 = vld [vmem:[%s1707_s25 + $0xc8] sm:$0xff]   ;;  %v210_v14 = vld [vmem:[%s1707_s25 + $0xd0] sm:$0xff]  }
  0x16   : > { %203 = vst [vmem:[%s134_s26 + $0x60] sm:$0xff] %v202_v12   ;;  %207 = vst [vmem:[%s134_s26 + $0x68] sm:$0xff] %v206_v13   ;;  %v214_v15 = vld [vmem:[%s1707_s25 + $0xd8] sm:$0xff]  }
  0x17   : > { %211 = vst [vmem:[%s134_s26 + $0x70] sm:$0xff] %v210_v14   ;;  %215 = vst [vmem:[%s134_s26 + $0x78] sm:$0xff] %v214_v15  }
  0x18 PF: > { %p1277_p5 = scmp.ge.s32.totalorder %s1648_s14, 1  ;;  %p304_p6 = scmp.lt.s32.totalorder %s1648_s14, 3 }
  0x1a   : > { %p305_p7 = pnand %p1277_p5, %p304_p6 }
  0x1c   : > { %308 = sbr.rel (%p305_p7) target bundleno = 989 (0x3dd), region = 69 }
  0x21   : > { %v1474_v16 = vld [vmem:[%s2209_s1 + $0x38] sm:$0xff]   ;;  %s311_s29 = sand.u32 1, %s1640_s12   ;;  %v1475_v17 = vld [vmem:[%s2209_s1 + $0x30] sm:$0xff]   ;;  %v1476_v18 = vld [vmem:[%s2209_s1 + $0x28] sm:$0xff]   ;;  %vm1651_vm0 = vmmov 0   ;;  %p334_p8 = scmp.lt.s32.totalorder %s1270_s15, 1 }
  0x22   : > { %1348 = vmatprep.subr.bf16.mxu0 %v1474_v16  ;;  %1431 = vmatprep.subr.bf16.mxu1 %v1474_v16  ;;  %s1278_s5 = sshll.u32 %s311_s29, 7  ;;  %v1477_v19 = vld [vmem:[%s2209_s1 + $0x20] sm:$0xff]   ;;  %v1478_v22 = vld [vmem:[%s2209_s1 + $0x18] sm:$0xff]   ;;  %v1479_v23 = vld [vmem:[%s2209_s1 + $0x10] sm:$0xff]  }
  0x23   : > { %1349 = vmatpush3.bf16.msra.mxu0 %v1474_v16  ;;  %1439 = vmatpush3.bf16.msra.mxu1 %v1474_v16  ;;  %s1740_s10 = scalar_lea.vmem [#allocation2], %s1278_s5  ;;  %v1480_v24 = vld [vmem:[%s2209_s1 + $0x8] sm:$0xff]   ;;  %v1481_v25 = vld [vmem:[%s2209_s1] sm:$0xff]   ;;  %s2270_s15 = smov (!%p334_p8, %s1270_s15), 1 }
  0x24   : > { %1350 = vmatprep.subr.bf16.mxu0 %v1475_v17  ;;  %1432 = vmatprep.subr.bf16.mxu1 %v1475_v17  ;;  %v1482_v20 = vld [vmem:[%s1740_s10] sm:$0xff]   ;;  %v1484_v26 = vld [vmem:[%s1740_s10 + $0x8] sm:$0xff]   ;;  %v1486_v28 = vld [vmem:[%s1740_s10 + $0x10] sm:$0xff]   ;;  %s1279_s7 = sshll.u32 %s2270_s15, 3 }
  0x25   : > { %v1483_v21 = vld [vmem:[%s1740_s10 + $0x40] sm:$0xff]   ;;  %1364 = vmatprep.mubr.bf16.mxu0 %v1482_v20  ;;  %v1485_v27 = vld [vmem:[%s1740_s10 + $0x48] sm:$0xff]   ;;  %v1487_v29 = vld [vmem:[%s1740_s10 + $0x50] sm:$0xff]  }
  0x26   : > { %1380 = vmatprep.mubr.bf16.mxu1 %v1483_v21  ;;  %v1488_v30 = vld [vmem:[%s1740_s10 + $0x18] sm:$0xff]   ;;  %v1490_v32 = vld [vmem:[%s1740_s10 + $0x20] sm:$0xff]   ;;  %v1492_v34 = vld [vmem:[%s1740_s10 + $0x28] sm:$0xff]  }
  0x27   : > { %1351 = vmatpush3.bf16.msra.mxu0 %v1475_v17  ;;  %1440 = vmatpush3.bf16.msra.mxu1 %v1475_v17  ;;  %v1489_v31 = vld [vmem:[%s1740_s10 + $0x58] sm:$0xff]   ;;  %v1491_v33 = vld [vmem:[%s1740_s10 + $0x60] sm:$0xff]   ;;  %v1493_v35 = vld [vmem:[%s1740_s10 + $0x68] sm:$0xff]  }
  0x28   : > { %1352 = vmatprep.subr.bf16.mxu0 %v1476_v18  ;;  %1433 = vmatprep.subr.bf16.mxu1 %v1476_v18  ;;  %v1494_v36 = vld [vmem:[%s1740_s10 + $0x30] sm:$0xff]   ;;  %v1495_v38 = vld [vmem:[%s1740_s10 + $0x38] sm:$0xff]  }
  0x29   : > { %v1496_v37 = vld [vmem:[%s1740_s10 + $0x70] sm:$0xff]   ;;  %v1497_v39 = vld [vmem:[%s1740_s10 + $0x78] sm:$0xff]   ;;  %s337_s10 = scalar_lea.vmem %s2211_s3, %s1279_s7 }
  0x2b   : > { %1353 = vmatpush3.bf16.msra.mxu0 %v1476_v18  ;;  %1441 = vmatpush3.bf16.msra.mxu1 %v1476_v18 }
  0x2c   : > { %1354 = vmatprep.subr.bf16.mxu0 %v1477_v19  ;;  %1434 = vmatprep.subr.bf16.mxu1 %v1477_v19 }
  0x2f   : > { %1355 = vmatpush3.bf16.msra.mxu0 %v1477_v19  ;;  %1442 = vmatpush3.bf16.msra.mxu1 %v1477_v19 }
  0x30   : > { %1356 = vmatprep.subr.bf16.mxu0 %v1478_v22  ;;  %1435 = vmatprep.subr.bf16.mxu1 %v1478_v22 }
  0x33   : > { %1357 = vmatpush3.bf16.msra.mxu0 %v1478_v22  ;;  %1443 = vmatpush3.bf16.msra.mxu1 %v1478_v22 }
  0x34   : > { %1358 = vmatprep.subr.bf16.mxu0 %v1479_v23  ;;  %1436 = vmatprep.subr.bf16.mxu1 %v1479_v23 }
  0x37   : > { %1359 = vmatpush3.bf16.msra.mxu0 %v1479_v23  ;;  %1444 = vmatpush3.bf16.msra.mxu1 %v1479_v23 }
  0x38   : > { %1360 = vmatprep.subr.bf16.mxu0 %v1480_v24  ;;  %1437 = vmatprep.subr.bf16.mxu1 %v1480_v24 }
  0x3b   : > { %1361 = vmatpush3.bf16.msra.mxu0 %v1480_v24  ;;  %1445 = vmatpush3.bf16.msra.mxu1 %v1480_v24 }
  0x3c   : > { %1362 = vmatprep.subr.bf16.mxu0 %v1481_v25  ;;  %1438 = vmatprep.subr.bf16.mxu1 %v1481_v25 }
  0x3f   : > { %1363 = vmatpush3.bf16.msra.mxu0 %v1481_v25  ;;  %1446 = vmatpush3.bf16.msra.mxu1 %v1481_v25 }
  0x42   : > { %1365 = vmatmul.mubr.bf16.vlgmr.msra.gmra.mxu0 %v1484_v26  ;;  %1381 = vmatmul.mubr.bf16.vlgmr.msra.gmra.mxu1 %v1485_v27 }
  0x43   : > { %1368 = vmatprep.mubr.bf16.mxu0 %v1486_v28  ;;  %1384 = vmatprep.mubr.bf16.mxu1 %v1487_v29 }
  0x4a   : > { %1369 = vmatmul.mubr.bf16.gmra.mxu0 %v1488_v30  ;;  %1385 = vmatmul.mubr.bf16.gmra.mxu1 %v1489_v31 }
  0x4b   : > { %1372 = vmatprep.mubr.bf16.mxu0 %v1490_v32  ;;  %1388 = vmatprep.mubr.bf16.mxu1 %v1491_v33 }
  0x52   : > { %1373 = vmatmul.mubr.bf16.gmra.mxu0 %v1492_v34  ;;  %1389 = vmatmul.mubr.bf16.gmra.mxu1 %v1493_v35 }
  0x53   : > { %1376 = vmatprep.mubr.bf16.mxu0 %v1494_v36  ;;  %1392 = vmatprep.mubr.bf16.mxu1 %v1496_v37 }
  0x5a   : > { %1377 = vmatmul.mubr.bf16.gmra.mxu0 %v1495_v38  ;;  %1393 = vmatmul.mubr.bf16.gmra.mxu1 %v1497_v39 }
 0x102   : > { %v1770_v40 = vpop.f32.mrf.mxu0  ;;  %v1772_v41 = vpop.f32.mrf.mxu1 }
 0x104   : > { %v1774_v42 = vpop.f32.mrf.mxu0  ;;  %v1776_v43 = vpop.f32.mrf.mxu1 }
 0x106   : > { %v1778_v44 = vpop.f32.mrf.mxu0  ;;  %v1780_v45 = vpop.f32.mrf.mxu1 }
 0x108   : > { %v1782_v46 = vpop.f32.mrf.mxu0  ;;  %v1784_v47 = vpop.f32.mrf.mxu1 }
 0x10a   : > { %v1786_v48 = vpop.f32.mrf.mxu0  ;;  %v1788_v49 = vpop.f32.mrf.mxu1 }
 0x10c   : > { %v1790_v50 = vpop.f32.mrf.mxu0  ;;  %v1792_v51 = vpop.f32.mrf.mxu1 }
 0x10e   : > { %v1371_v52 = vpop.f32.mrf.mxu0  ;;  %v1387_v53 = vpop.f32.mrf.mxu1 }
 0x10f   : > { %738 = vmax.xlane.f32.xlu1 %v1387_v53  ;;  %706 = vmax.xlane.f32.xlu0 %v1371_v52 }
 0x110   : > { %v1794_v54 = vpop.f32.mrf.mxu0  ;;  %v1796_v55 = vpop.f32.mrf.mxu1 }
 0x112   : > { %v1374_v56 = vpop.f32.mrf.mxu0  ;;  %v1390_v57 = vpop.f32.mrf.mxu1 }
 0x113   : > { %744 = vmax.xlane.f32.xlu1 %v1390_v57  ;;  %712 = vmax.xlane.f32.xlu0 %v1374_v56 }
 0x114   : > { %v597_v58 = vpop.f32.mrf.mxu0  ;;  %v661_v59 = vpop.f32.mrf.mxu1 }
 0x116   : > { %v1798_v60 = vpop.f32.mrf.mxu0  ;;  %v1391_v61 = vpop.f32.mrf.mxu1 }
 0x117   : > { %740 = vmax.xlane.f32.xlu1 %v661_v59  ;;  %708 = vmax.xlane.f32.xlu0 %v597_v58 }
 0x118   : > { %v1801_v62 = vpop.f32.mrf.mxu0  ;;  %v1803_v63 = vpop.f32.mrf.mxu1 }
 0x11a   : > { %v1805_v0 = vpop.f32.mrf.mxu0  ;;  %v1811_v2 = vpop.f32.mrf.mxu1 }
 0x11b   : > { %746 = vmax.xlane.f32.xlu1 %v1391_v61  ;;  %714 = vmax.xlane.f32.xlu0 %v1798_v60 }
 0x11c   : > { %v1809_v1 = vpop.f32.mrf.mxu0  ;;  %v1817_v4 = vpop.f32.mrf.mxu1 }
 0x11e   : > { %v1815_v3 = vpop.f32.mrf.mxu0  ;;  %v1821_v5 = vpop.f32.mrf.mxu1 }
 0x11f   : > { %742 = vmax.xlane.f32.xlu1 %v1803_v63  ;;  %710 = vmax.xlane.f32.xlu0 %v1801_v62 }
 0x120   : > { %v1825_v6 = vpop.f32.mrf.mxu0  ;;  %v1827_v7 = vpop.f32.mrf.mxu1 }
 0x123   : > { %720 = vmax.xlane.f32.xlu1 %v1805_v0  ;;  %716 = vmax.xlane.f32.xlu0 %v1809_v1 }
 0x127   : > { %752 = vmax.xlane.f32.xlu1 %v1811_v2  ;;  %722 = vmax.xlane.f32.xlu0 %v1815_v3 }
 0x12b   : > { %748 = vmax.xlane.f32.xlu1 %v1817_v4  ;;  %754 = vmax.xlane.f32.xlu0 %v1821_v5 }
 0x12f   : > { %750 = vmax.xlane.f32.xlu1 %v1827_v7  ;;  %718 = vmax.xlane.f32.xlu0 %v1825_v6 }
 0x133   : > { %736 = vmax.xlane.f32.xlu1 %v1788_v49  ;;  %704 = vmax.xlane.f32.xlu0 %v1786_v48 }
 0x137   : > { %734 = vmax.xlane.f32.xlu1 %v1796_v55  ;;  %702 = vmax.xlane.f32.xlu0 %v1794_v54 }
 0x13b   : > { %732 = vmax.xlane.f32.xlu1 %v1792_v51  ;;  %700 = vmax.xlane.f32.xlu0 %v1790_v50 }
 0x13f   : > { %730 = vmax.xlane.f32.xlu1 %v1780_v45  ;;  %698 = vmax.xlane.f32.xlu0 %v1778_v44 }
 0x143   : > { %728 = vmax.xlane.f32.xlu1 %v1772_v41  ;;  %696 = vmax.xlane.f32.xlu0 %v1770_v40 }
 0x147   : > { %726 = vmax.xlane.f32.xlu1 %v1784_v47  ;;  %694 = vmax.xlane.f32.xlu0 %v1782_v46 }
 0x14b   : > { %724 = vmax.xlane.f32.xlu1 %v1776_v43  ;;  %692 = vmax.xlane.f32.xlu0 %v1774_v42 }
 0x198   : > { %v739_v8 = vpop.xlane.xlu1 %738  ;;  %v707_v9 = vpop.xlane.xlu0 %706 }
 0x199   : > { %v1845_v10 = vsub.f32 %v1387_v53, %v739_v8  ;;  %v1847_v11 = vsub.f32 %v1371_v52, %v707_v9 }
 0x19b   : > { %2230 = vst [vmem:[#allocation3_spill] sm:$0xff] %v1845_v10  ;;  %2231 = vst [vmem:[#allocation4_spill] sm:$0xff] %v1847_v11  ;;  %v834_v12 = vmul.f32 1.442695, %v1845_v10  ;;  %v802_v13 = vmul.f32 1.442695, %v1847_v11 }
 0x19c   : > { %v745_v14 = vpop.xlane.xlu1 %744  ;;  %v713_v15 = vpop.xlane.xlu0 %712 }
 0x19d   : > { %1498 = vpow2.f32 %v834_v12  ;;  %v1851_v16 = vsub.f32 %v1390_v57, %v745_v14  ;;  %v1853_v17 = vsub.f32 %v1374_v56, %v713_v15 }
 0x19e   : > { %1500 = vpow2.f32 %v802_v13 }
 0x19f   : > { %v840_v18 = vmul.f32 1.442695, %v1851_v16  ;;  %v808_v19 = vmul.f32 1.442695, %v1853_v17 }
 0x1a0   : > { %v741_v20 = vpop.xlane.xlu1 %740  ;;  %v709_v21 = vpop.xlane.xlu0 %708 }
 0x1a1   : > { %1502 = vpow2.f32 %v840_v18  ;;  %v1857_v22 = vsub.f32 %v661_v59, %v741_v20  ;;  %v1859_v23 = vsub.f32 %v597_v58, %v709_v21 }
 0x1a2   : > { %1504 = vpow2.f32 %v808_v19 }
 0x1a3   : > { %v836_v24 = vmul.f32 1.442695, %v1857_v22  ;;  %v804_v25 = vmul.f32 1.442695, %v1859_v23 }
 0x1a4   : > { %v747_v26 = vpop.xlane.xlu1 %746  ;;  %v715_v27 = vpop.xlane.xlu0 %714 }
 0x1a5   : > { %1506 = vpow2.f32 %v836_v24  ;;  %v1863_v28 = vsub.f32 %v1391_v61, %v747_v26  ;;  %v1866_v29 = vsub.f32 %v1798_v60, %v715_v27 }
 0x1a6   : > { %1508 = vpow2.f32 %v804_v25 }
 0x1a7   : > { %v842_v30 = vmul.f32 1.442695, %v1863_v28  ;;  %v810_v31 = vmul.f32 1.442695, %v1866_v29 }
 0x1a8   : > { %v743_v32 = vpop.xlane.xlu1 %742  ;;  %v711_v33 = vpop.xlane.xlu0 %710 }
 0x1a9   : > { %1510 = vpow2.f32 %v842_v30  ;;  %v1871_v34 = vsub.f32 %v1803_v63, %v743_v32  ;;  %v1874_v35 = vsub.f32 %v1801_v62, %v711_v33 }
 0x1aa   : > { %v1876_v36 = vpop.eup %1498  ;;  %1512 = vpow2.f32 %v810_v31 }
 0x1ab   : > { %v1878_v37 = vpop.eup %1500  ;;  %v838_v38 = vmul.f32 1.442695, %v1871_v34  ;;  %v806_v39 = vmul.f32 1.442695, %v1874_v35  ;;  %898 = vadd.xlane.f32.xlu1 %v1876_v36 }
 0x1ac   : > { %866 = vadd.xlane.f32.xlu0 %v1878_v37  ;;  %v721_v52 = vpop.xlane.xlu1 %720  ;;  %v717_v53 = vpop.xlane.xlu0 %716 }
 0x1ad   : > { %1514 = vpow2.f32 %v838_v38  ;;  %v1885_v56 = vsub.f32 %v1805_v0, %v721_v52  ;;  %v1890_v58 = vsub.f32 %v1809_v1, %v717_v53 }
 0x1ae   : > { %v1887_v57 = vpop.eup %1502  ;;  %1516 = vpow2.f32 %v806_v39 }
 0x1af   : > { %v1892_v59 = vpop.eup %1504  ;;  %v816_v60 = vmul.f32 1.442695, %v1885_v56  ;;  %904 = vadd.xlane.f32.xlu1 %v1887_v57  ;;  %v812_v8 = vmul.f32 1.442695, %v1890_v58 }
 0x1b0   : > { %872 = vadd.xlane.f32.xlu0 %v1892_v59  ;;  %v753_v61 = vpop.xlane.xlu1 %752  ;;  %v723_v62 = vpop.xlane.xlu0 %722 }
 0x1b1   : > { %1518 = vpow2.f32 %v816_v60  ;;  %v1898_v63 = vsub.f32 %v1811_v2, %v753_v61  ;;  %v1904_v1 = vsub.f32 %v1815_v3, %v723_v62 }
 0x1b2   : > { %v1900_v0 = vpop.eup %1506 }
 0x1b3   : > { %v1906_v9 = vpop.eup %1508  ;;  %v848_v12 = vmul.f32 1.442695, %v1898_v63  ;;  %900 = vadd.xlane.f32.xlu1 %v1900_v0  ;;  %v818_v3 = vmul.f32 1.442695, %v1904_v1 }
 0x1b4   : > { %868 = vadd.xlane.f32.xlu0 %v1906_v9  ;;  %v749_v13 = vpop.xlane.xlu1 %748  ;;  %v755_v14 = vpop.xlane.xlu0 %754 }
 0x1b5   : > { %1520 = vpow2.f32 %v848_v12  ;;  %v1912_v2 = vsub.f32 %v1817_v4, %v749_v13  ;;  %v1915_v15 = vsub.f32 %v1821_v5, %v755_v14 }
 0x1b6   : > { %v1917_v18 = vpop.eup %1510  ;;  %1522 = vpow2.f32 %v812_v8 }
 0x1b7   : > { %v1920_v19 = vpop.eup %1512  ;;  %v844_v20 = vmul.f32 1.442695, %v1912_v2  ;;  %906 = vadd.xlane.f32.xlu1 %v1917_v18  ;;  %v850_v4 = vmul.f32 1.442695, %v1915_v15 }
 0x1b8   : > { %874 = vadd.xlane.f32.xlu0 %v1920_v19  ;;  %v751_v21 = vpop.xlane.xlu1 %750  ;;  %v719_v24 = vpop.xlane.xlu0 %718 }
 0x1b9   : > { %1524 = vpow2.f32 %v844_v20  ;;  %v1927_v5 = vsub.f32 %v1827_v7, %v751_v21  ;;  %v1930_v25 = vsub.f32 %v1825_v6, %v719_v24 }
 0x1ba   : > { %v1932_v26 = vpop.eup %1514  ;;  %1526 = vpow2.f32 %v818_v3 }
 0x1bb   : > { %v1934_v27 = vpop.eup %1516  ;;  %v814_v30 = vmul.f32 1.442695, %v1930_v25  ;;  %902 = vadd.xlane.f32.xlu1 %v1932_v26  ;;  %1528 = vpow2.f32 %v850_v4  ;;  %v846_v7 = vmul.f32 1.442695, %v1927_v5 }
 0x1bc   : > { %870 = vadd.xlane.f32.xlu0 %v1934_v27  ;;  %v737_v31 = vpop.xlane.xlu1 %736  ;;  %v705_v32 = vpop.xlane.xlu0 %704 }
 0x1bd   : > { %v1941_v33 = vsub.f32 %v1788_v49, %v737_v31  ;;  %v1944_v6 = vsub.f32 %v1786_v48, %v705_v32  ;;  %1530 = vpow2.f32 %v814_v30 }
 0x1be   : > { %v1946_v38 = vpop.eup %1518  ;;  %1532 = vpow2.f32 %v846_v7 }
 0x1bf   : > { %2232 = vst [vmem:[#allocation5_spill] sm:$0xff] %v1941_v33  ;;  %v800_v39 = vmul.f32 1.442695, %v1944_v6  ;;  %v832_v60 = vmul.f32 1.442695, %v1941_v33 }
 0x1c0   : > { %880 = vadd.xlane.f32.xlu0 %v1946_v38  ;;  %v735_v52 = vpop.xlane.xlu1 %734  ;;  %v703_v53 = vpop.xlane.xlu0 %702 }
 0x1c1   : > { %v1952_v61 = vsub.f32 %v1796_v55, %v735_v52  ;;  %v1955_v49 = vsub.f32 %v1794_v54, %v703_v53  ;;  %1534 = vpow2.f32 %v800_v39 }
 0x1c2   : > { %v1957_v48 = vpop.eup %1520  ;;  %1536 = vpow2.f32 %v832_v60 }
 0x1c3   : > { %2233 = vst [vmem:[#allocation6_spill] sm:$0xff] %v1952_v61  ;;  %2234 = vst [vmem:[#allocation7_spill] sm:$0xff] %v1955_v49  ;;  %v1959_v62 = vpop.eup %1522  ;;  %v798_v8 = vmul.f32 1.442695, %v1955_v49  ;;  %912 = vadd.xlane.f32.xlu1 %v1957_v48  ;;  %v830_v55 = vmul.f32 1.442695, %v1952_v61 }
 0x1c4   : > { %876 = vadd.xlane.f32.xlu0 %v1959_v62  ;;  %v733_v12 = vpop.xlane.xlu1 %732  ;;  %v701_v13 = vpop.xlane.xlu0 %700 }
 0x1c5   : > { %v1966_v14 = vsub.f32 %v1792_v51, %v733_v12  ;;  %v1969_v54 = vsub.f32 %v1790_v50, %v701_v13  ;;  %1538 = vpow2.f32 %v798_v8 }
 0x1c6   : > { %v1971_v3 = vpop.eup %1524  ;;  %1540 = vpow2.f32 %v830_v55 }
 0x1c7   : > { %2235 = vst [vmem:[#allocation8_spill] sm:$0xff] %v1966_v14  ;;  %2236 = vst [vmem:[#allocation9_spill] sm:$0xff] %v1969_v54  ;;  %v1973_v20 = vpop.eup %1526  ;;  %v796_v21 = vmul.f32 1.442695, %v1969_v54  ;;  %908 = vadd.xlane.f32.xlu1 %v1971_v3  ;;  %v828_v51 = vmul.f32 1.442695, %v1966_v14 }
 0x1c8   : > { %882 = vadd.xlane.f32.xlu0 %v1973_v20  ;;  %v731_v24 = vpop.xlane.xlu1 %730  ;;  %v699_v4 = vpop.xlane.xlu0 %698 }
 0x1c9   : > { %v1980_v30 = vsub.f32 %v1780_v45, %v731_v24  ;;  %v1983_v50 = vsub.f32 %v1778_v44, %v699_v4  ;;  %v1985_v31 = vpop.eup %1528  ;;  %1542 = vpow2.f32 %v796_v21 }
 0x1ca   : > { %v1987_v32 = vpop.eup %1530  ;;  %1544 = vpow2.f32 %v828_v51 }
 0x1cb   : > { %2237 = vst [vmem:[#allocation10_spill] sm:$0xff] %v1980_v30  ;;  %2238 = vst [vmem:[#allocation11_spill] sm:$0xff] %v1983_v50  ;;  %v794_v7 = vmul.f32 1.442695, %v1983_v50  ;;  %914 = vadd.xlane.f32.xlu1 %v1985_v31  ;;  %v826_v45 = vmul.f32 1.442695, %v1980_v30  ;;  %v1999_v60 = vpop.eup %1532 }
 0x1cc   : > { %878 = vadd.xlane.f32.xlu0 %v1987_v32  ;;  %v729_v39 = vpop.xlane.xlu1 %728  ;;  %v697_v52 = vpop.xlane.xlu0 %696 }
 0x1cd   : > { %v1994_v53 = vsub.f32 %v1772_v41, %v729_v39  ;;  %v1997_v44 = vsub.f32 %v1770_v40, %v697_v52  ;;  %1546 = vpow2.f32 %v794_v7 }
 0x1ce   : > { %v2001_v8 = vpop.eup %1534  ;;  %1548 = vpow2.f32 %v826_v45 }
 0x1cf   : > { %2239 = vst [vmem:[#allocation12_spill] sm:$0xff] %v1994_v53  ;;  %2240 = vst [vmem:[#allocation13_spill] sm:$0xff] %v1997_v44  ;;  %v792_v12 = vmul.f32 1.442695, %v1997_v44  ;;  %910 = vadd.xlane.f32.xlu1 %v1999_v60  ;;  %v824_v41 = vmul.f32 1.442695, %v1994_v53  ;;  %v2013_v24 = vpop.eup %1536 }
 0x1d0   : > { %864 = vadd.xlane.f32.xlu0 %v2001_v8  ;;  %v727_v13 = vpop.xlane.xlu1 %726  ;;  %v695_v55 = vpop.xlane.xlu0 %694 }
 0x1d1   : > { %v2008_v21 = vsub.f32 %v1784_v47, %v727_v13  ;;  %v2011_v40 = vsub.f32 %v1782_v46, %v695_v55  ;;  %1550 = vpow2.f32 %v792_v12 }
 0x1d2   : > { %v2015_v4 = vpop.eup %1538  ;;  %1552 = vpow2.f32 %v824_v41 }
 0x1d3   : > { %2241 = vst [vmem:[#allocation14_spill] sm:$0xff] %v2008_v21  ;;  %2242 = vst [vmem:[#allocation15_spill] sm:$0xff] %v2011_v40  ;;  %v790_v51 = vmul.f32 1.442695, %v2011_v40  ;;  %896 = vadd.xlane.f32.xlu1 %v2013_v24  ;;  %v822_v47 = vmul.f32 1.442695, %v2008_v21  ;;  %v2027_v45 = vpop.eup %1540 }
 0x1d4   : > { %862 = vadd.xlane.f32.xlu0 %v2015_v4  ;;  %v725_v7 = vpop.xlane.xlu1 %724  ;;  %v693_v39 = vpop.xlane.xlu0 %692 }
 0x1d5   : > { %v2022_v52 = vsub.f32 %v1776_v43, %v725_v7  ;;  %v2025_v46 = vsub.f32 %v1774_v42, %v693_v39  ;;  %1554 = vpow2.f32 %v790_v51 }
 0x1d6   : > { %v2029_v12 = vpop.eup %1542  ;;  %1556 = vpow2.f32 %v822_v47 }
 0x1d7   : > { %2243 = vst [vmem:[#allocation16_spill] sm:$0xff] %v2022_v52  ;;  %2244 = vst [vmem:[#allocation17_spill] sm:$0xff] %v2025_v46  ;;  %v788_v13 = vmul.f32 1.442695, %v2025_v46  ;;  %894 = vadd.xlane.f32.xlu1 %v2027_v45  ;;  %v820_v55 = vmul.f32 1.442695, %v2022_v52  ;;  %v2035_v41 = vpop.eup %1544 }
 0x1d8   : > { %860 = vadd.xlane.f32.xlu0 %v2029_v12 }
 0x1d9   : > { %1558 = vpow2.f32 %v788_v13 }
 0x1da   : > { %v2037_v43 = vpop.eup %1546  ;;  %1560 = vpow2.f32 %v820_v55 }
 0x1db   : > { %892 = vadd.xlane.f32.xlu1 %v2035_v41  ;;  %v2041_v42 = vpop.eup %1548 }
 0x1dc   : > { %858 = vadd.xlane.f32.xlu0 %v2037_v43 }
 0x1de   : > { %v2043_v51 = vpop.eup %1550 }
 0x1df   : > { %890 = vadd.xlane.f32.xlu1 %v2041_v42  ;;  %v2047_v7 = vpop.eup %1552 }
 0x1e0   : > { %856 = vadd.xlane.f32.xlu0 %v2043_v51 }
 0x1e2   : > { %v2049_v39 = vpop.eup %1554 }
 0x1e3   : > { %888 = vadd.xlane.f32.xlu1 %v2047_v7  ;;  %v2053_v47 = vpop.eup %1556 }
 0x1e4   : > { %854 = vadd.xlane.f32.xlu0 %v2049_v39  ;;  %2245 = vst [vmem:[#allocation18_spill] sm:$0xff] %v2053_v47 }
 0x1e6   : > { %v2055_v13 = vpop.eup %1558 }
 0x1e7   : > { %2246 = vst [vmem:[#allocation19_spill] sm:$0xff] %v2055_v13  ;;  %886 = vadd.xlane.f32.xlu1 %v2053_v47  ;;  %v2059_v55 = vpop.eup %1560 }
 0x1e8   : > { %852 = vadd.xlane.f32.xlu0 %v2055_v13  ;;  %2247 = vst [vmem:[#allocation20_spill] sm:$0xff] %v2059_v55 }
 0x1eb   : > { %884 = vadd.xlane.f32.xlu1 %v2059_v55 }
 0x234   : > { %v899_v52 = vpop.xlane.xlu1 %898 }
 0x235   : > { %v867_v46 = vpop.xlane.xlu0 %866 }
 0x238   : > { %v905_v21 = vpop.xlane.xlu1 %904 }
 0x239   : > { %v873_v40 = vpop.xlane.xlu0 %872  ;;  %v942_v49 = vsub.f32 %v905_v21, %v1887_v57 }
 0x23a   : > { %v926_v54 = vsub.f32 %v873_v40, %v1892_v59 }
 0x23b   : > { %1562 = vlog2.f32 %v942_v49 }
 0x23c   : > { %v901_v53 = vpop.xlane.xlu1 %900  ;;  %1564 = vlog2.f32 %v926_v54 }
 0x23d   : > { %v869_v44 = vpop.xlane.xlu0 %868  ;;  %v940_v11 = vsub.f32 %v901_v53, %v1900_v0 }
 0x23e   : > { %v924_v55 = vsub.f32 %v869_v44, %v1906_v9  ;;  %v939_v9 = vsub.f32 %v899_v52, %v1876_v36 }
 0x240   : > { %v907_v30 = vpop.xlane.xlu1 %906 }
 0x241   : > { %v875_v50 = vpop.xlane.xlu0 %874  ;;  %v943_v33 = vsub.f32 %v907_v30, %v1917_v18 }
 0x242   : > { %v927_v59 = vsub.f32 %v875_v50, %v1920_v19 }
 0x244   : > { %v903_v61 = vpop.xlane.xlu1 %902 }
 0x245   : > { %v871_v14 = vpop.xlane.xlu0 %870  ;;  %v941_v19 = vsub.f32 %v903_v61, %v1932_v26 }
 0x246   : > { %v925_v36 = vsub.f32 %v871_v14, %v1934_v27 }
 0x248   : > { %v1563_v30 = vpop.eup %1562 }
 0x249   : > { %v881_v13 = vpop.xlane.xlu0 %880  ;;  %v1001_v26 = vmul.f32 0.6931472, %v1563_v30 }
 0x24a   : > { %v930_v10 = vsub.f32 %v881_v13, %v1946_v38 }
 0x24c   : > { %1566 = vlog2.f32 %v930_v10  ;;  %v913_v47 = vpop.xlane.xlu1 %912 }
 0x24d   : > { %1568 = vlog2.f32 %v940_v11  ;;  %v946_v57 = vsub.f32 %v913_v47, %v1957_v48  ;;  %v877_v21 = vpop.xlane.xlu0 %876  ;;  %v923_v11 = vsub.f32 %v867_v46, %v1878_v37 }
 0x24e   : > { %1570 = vlog2.f32 %v924_v55  ;;  %v928_v49 = vsub.f32 %v877_v21, %v1959_v62 }
 0x24f   : > { %1572 = vlog2.f32 %v946_v57 }
 0x250   : > { %1574 = vlog2.f32 %v928_v49  ;;  %v909_v0 = vpop.xlane.xlu1 %908 }
 0x251   : > { %1576 = vlog2.f32 %v943_v33  ;;  %v944_v10 = vsub.f32 %v909_v0, %v1971_v3  ;;  %v883_v38 = vpop.xlane.xlu0 %882  ;;  %v1565_v3 = vpop.eup %1564 }
 0x252   : > { %1578 = vlog2.f32 %v927_v59  ;;  %v931_v18 = vsub.f32 %v883_v38, %v1973_v20  ;;  %v969_v61 = vmul.f32 0.6931472, %v1565_v3  ;;  %v1038_v59 = vsub.f32 %v1851_v16, %v1001_v26 }
 0x253   : > { %1580 = vlog2.f32 %v944_v10 }
 0x254   : > { %1582 = vlog2.f32 %v931_v18  ;;  %v915_v48 = vpop.xlane.xlu1 %914  ;;  %v1022_v21 = vsub.f32 %v1853_v17, %v969_v61 }
 0x255   : > { %1584 = vlog2.f32 %v939_v9  ;;  %v947_v62 = vsub.f32 %v915_v48, %v1985_v31  ;;  %v879_v54 = vpop.xlane.xlu0 %878 }
 0x256   : > { %1586 = vlog2.f32 %v923_v11  ;;  %v929_v33 = vsub.f32 %v879_v54, %v1987_v32  ;;  %v1054_v30 = vsub.f32 %v1022_v21, %v1038_v59 }
 0x257   : > { %1588 = vlog2.f32 %v947_v62 }
 0x258   : > { %1590 = vlog2.f32 %v929_v33  ;;  %v911_v37 = vpop.xlane.xlu1 %910 }
 0x259   : > { %v1567_v20 = vpop.eup %1566  ;;  %1592 = vlog2.f32 %v941_v19  ;;  %v945_v50 = vsub.f32 %v911_v37, %v1999_v60  ;;  %v865_v53 = vpop.xlane.xlu0 %864 }
 0x25a   : > { %v1569_v44 = vpop.eup %1568  ;;  %1594 = vlog2.f32 %v925_v36  ;;  %v922_v31 = vsub.f32 %v865_v53, %v2001_v8  ;;  %v977_v52 = vmul.f32 0.6931472, %v1567_v20 }
 0x25b   : > { %v1571_v40 = vpop.eup %1570  ;;  %1596 = vlog2.f32 %v945_v50  ;;  %v997_v60 = vmul.f32 0.6931472, %v1569_v44 }
 0x25c   : > { %v1573_v27 = vpop.eup %1572  ;;  %1598 = vlog2.f32 %v922_v31  ;;  %v897_v14 = vpop.xlane.xlu1 %896  ;;  %v1026_v8 = vsub.f32 %v1885_v56, %v977_v52  ;;  %v965_v10 = vmul.f32 0.6931472, %v1571_v40 }
 0x25d   : > { %v1575_v32 = vpop.eup %1574  ;;  %v1009_v46 = vmul.f32 0.6931472, %v1573_v27  ;;  %v938_v47 = vsub.f32 %v897_v14, %v2013_v24  ;;  %v863_v13 = vpop.xlane.xlu0 %862  ;;  %v1036_v56 = vsub.f32 %v1857_v22, %v997_v60 }
 0x25e   : > { %v1577_v55 = vpop.eup %1576  ;;  %v973_v57 = vmul.f32 0.6931472, %v1575_v32  ;;  %v921_v24 = vsub.f32 %v863_v13, %v2015_v4  ;;  %v1020_v50 = vsub.f32 %v1859_v23, %v965_v10  ;;  %v1070_v32 = vand.u32 2147483647, %v1054_v30 }
 0x25f   : > { %v1579_v49 = vpop.eup %1578  ;;  %1600 = vlog2.f32 %v938_v47  ;;  %v1042_v0 = vsub.f32 %v1898_v63, %v1009_v46  ;;  %v1003_v4 = vmul.f32 0.6931472, %v1577_v55 }
 0x260   : > { %v1581_v9 = vpop.eup %1580  ;;  %v895_v38 = vpop.xlane.xlu1 %894  ;;  %v1024_v54 = vsub.f32 %v1890_v58, %v973_v57  ;;  %v971_v20 = vmul.f32 0.6931472, %v1579_v49  ;;  %v1052_v46 = vsub.f32 %v1020_v50, %v1036_v56  ;;  %v2249_v56 = vld [vmem:[#allocation18_spill] sm:$0xff] }
 0x261   : > { %v1583_v11 = vpop.eup %1582  ;;  %v1005_v18 = vmul.f32 0.6931472, %v1581_v9  ;;  %v937_v48 = vsub.f32 %v895_v38, %v2027_v45  ;;  %v861_v19 = vpop.xlane.xlu0 %860  ;;  %v1058_v62 = vsub.f32 %v1026_v8, %v1042_v0 }
 0x262   : > { %v1585_v17 = vpop.eup %1584  ;;  %v920_v16 = vsub.f32 %v861_v19, %v2029_v12  ;;  %v979_v36 = vmul.f32 0.6931472, %v1583_v11  ;;  %v1023_v57 = vsub.f32 %v1866_v29, %v971_v20 }
 0x263   : > { %v1587_v63 = vpop.eup %1586  ;;  %1602 = vlog2.f32 %v937_v48  ;;  %v1074_v33 = vand.u32 2147483647, %v1058_v62  ;;  %v1040_v3 = vsub.f32 %v1912_v2, %v1005_v18  ;;  %v995_v9 = vmul.f32 0.6931472, %v1585_v17  ;;  %v2248_v17 = vld [vmem:[#allocation5_spill] sm:$0xff] }
 0x264   : > { %v1589_v37 = vpop.eup %1588  ;;  %1604 = vlog2.f32 %v920_v16  ;;  %v893_v45 = vpop.xlane.xlu1 %892  ;;  %v1027_v52 = vsub.f32 %v1904_v1, %v979_v36  ;;  %v963_v10 = vmul.f32 0.6931472, %v1587_v63  ;;  %v1068_v18 = vand.u32 2147483647, %v1052_v46  ;;  %v2256_v46 = vld [vmem:[#allocation8_spill] sm:$0xff] }
 0x265   : > { %v1591_v53 = vpop.eup %1590  ;;  %v1011_v12 = vmul.f32 0.6931472, %v1589_v37  ;;  %1606 = vlog2.f32 %v921_v24  ;;  %v936_v58 = vsub.f32 %v893_v45, %v2035_v41  ;;  %v859_v44 = vpop.xlane.xlu0 %858  ;;  %1104 = vmax.xlane.f32.xlu1 %v1074_v33  ;;  %v1056_v22 = vsub.f32 %v1024_v54, %v1040_v3  ;;  %v2250_v33 = vld [vmem:[#allocation3_spill] sm:$0xff] }
 0x266   : > { %v1593_v26 = vpop.eup %1592  ;;  %v975_v61 = vmul.f32 0.6931472, %v1591_v53  ;;  %v919_v31 = vsub.f32 %v859_v44, %v2037_v43  ;;  %v1039_v41 = vsub.f32 %v1863_v28, %v1003_v4  ;;  %v2251_v37 = vld [vmem:[#allocation19_spill] sm:$0xff] }
 0x267   : > { %v1595_v2 = vpop.eup %1594  ;;  %1608 = vlog2.f32 %v936_v58  ;;  %v1072_v40 = vand.u32 2147483647, %v1056_v22  ;;  %v1043_v27 = vsub.f32 %v1915_v15, %v1011_v12  ;;  %v999_v21 = vmul.f32 0.6931472, %v1593_v26 }
 0x268   : > { %v1597_v23 = vpop.eup %1596  ;;  %1610 = vlog2.f32 %v919_v31  ;;  %v891_v14 = vpop.xlane.xlu1 %890  ;;  %v967_v1 = vmul.f32 0.6931472, %v1595_v2  ;;  %v1025_v59 = vsub.f32 %v1930_v25, %v975_v61  ;;  %v1055_v24 = vsub.f32 %v1023_v57, %v1039_v41  ;;  %v2253_v31 = vld [vmem:[#allocation20_spill] sm:$0xff] }
 0x269   : > { %v1599_v47 = vpop.eup %1598  ;;  %v1007_v13 = vmul.f32 0.6931472, %v1597_v23  ;;  %v935_v55 = vsub.f32 %v891_v14, %v2041_v42  ;;  %v857_v60 = vpop.xlane.xlu0 %856  ;;  %1100 = vmax.xlane.f32.xlu1 %v1072_v40  ;;  %v1059_v43 = vsub.f32 %v1027_v52, %v1043_v27  ;;  %v2254_v27 = vld [vmem:[#allocation6_spill] sm:$0xff]  ;;  %v2255_v14 = vld [vmem:[#allocation9_spill] sm:$0xff] }
 0x26a   : > { %v918_v15 = vsub.f32 %v857_v60, %v2043_v51  ;;  %v961_v49 = vmul.f32 0.6931472, %v1599_v47  ;;  %v1021_v48 = vsub.f32 %v1874_v35, %v967_v1  ;;  %v1035_v35 = vsub.f32 %v2250_v33, %v995_v9 }
 0x26b   : > { %1612 = vlog2.f32 %v935_v55  ;;  %v1075_v8 = vand.u32 2147483647, %v1059_v43  ;;  %v1041_v28 = vsub.f32 %v1927_v5, %v1007_v13  ;;  %v1037_v5 = vsub.f32 %v1871_v34, %v999_v21  ;;  %v2257_v21 = vld [vmem:[#allocation7_spill] sm:$0xff] }
 0x26c   : > { %v1601_v0 = vpop.eup %1600  ;;  %1614 = vlog2.f32 %v918_v15  ;;  %v889_v42 = vpop.xlane.xlu1 %888  ;;  %v1018_v62 = vsub.f32 %v1944_v6, %v961_v49  ;;  %v2252_v6 = vld [vmem:[#allocation4_spill] sm:$0xff]  ;;  %v1071_v53 = vand.u32 2147483647, %v1055_v24  ;;  %v1650_v55 = vmov 0.0  }
 0x26d   : > { %v993_v38 = vmul.f32 0.6931472, %v1601_v0  ;;  %v934_v11 = vsub.f32 %v889_v42, %v2047_v7  ;;  %v855_v29 = vpop.xlane.xlu0 %854  ;;  %1096 = vmax.xlane.f32.xlu1 %v1070_v32  ;;  %1106 = vmax.xlane.f32.xlu0 %v1075_v8  ;;  %v1057_v51 = vsub.f32 %v1025_v59, %v1041_v28  ;;  %v1053_v20 = vsub.f32 %v1021_v48, %v1037_v5  ;;  %v2258_v28 = vld [vmem:[#allocation10_spill] sm:$0xff]  ;;  %v2261_v48 = vld [vmem:[#allocation12_spill] sm:$0xff] }
 0x26e   : > { %v917_v25 = vsub.f32 %v855_v29, %v2049_v39  ;;  %v1019_v45 = vsub.f32 %v2252_v6, %v963_v10  ;;  %1396 = vmatprep.subr.mxu1 %v1650_v55  ;;  %v2259_v10 = vld [vmem:[#allocation11_spill] sm:$0xff]  ;;  %1428 = vmatprep.mubr.msk.f32.mxu1 %vm1651_vm0, %v1650_v55 }
 0x26f   : > { %1616 = vlog2.f32 %v934_v11  ;;  %v1073_v19 = vand.u32 2147483647, %v1057_v51  ;;  %v1034_v16 = vsub.f32 %v2248_v17, %v993_v38  ;;  %v1069_v40 = vand.u32 2147483647, %v1053_v20  ;;  %v2265_v20 = vld [vmem:[#allocation16_spill] sm:$0xff] }
 0x270   : > { %v1603_v54 = vpop.eup %1602  ;;  %1618 = vlog2.f32 %v917_v25  ;;  %v887_v7 = vpop.xlane.xlu1 %886  ;;  %v1051_v52 = vsub.f32 %v1019_v45, %v1035_v35  ;;  %v2260_v25 = vld [vmem:[#allocation13_spill] sm:$0xff] }
 0x271   : > { %v1605_v30 = vpop.eup %1604  ;;  %v933_v63 = vsub.f32 %v887_v7, %v2249_v56  ;;  %v853_v36 = vpop.xlane.xlu0 %852  ;;  %1092 = vmax.xlane.f32.xlu1 %v1068_v18  ;;  %1102 = vmax.xlane.f32.xlu0 %v1073_v19  ;;  %v1050_v39 = vsub.f32 %v1018_v62, %v1034_v16  ;;  %v991_v34 = vmul.f32 0.6931472, %v1603_v54  ;;  %v2262_v56 = vld [vmem:[#allocation15_spill] sm:$0xff] }
 0x272   : > { %v1607_v3 = vpop.eup %1606  ;;  %v916_v4 = vsub.f32 %v853_v36, %v2251_v37  ;;  %v957_v50 = vmul.f32 0.6931472, %v1605_v30  ;;  %v1067_v15 = vand.u32 2147483647, %v1051_v52  ;;  %v2263_v36 = vld [vmem:[#allocation14_spill] sm:$0xff]  ;;  %v2264_v37 = vld [vmem:[#allocation17_spill] sm:$0xff] }
 0x273   : > { %1620 = vlog2.f32 %v933_v63  ;;  %v1066_v12 = vand.u32 2147483647, %v1050_v39  ;;  %v959_v26 = vmul.f32 0.6931472, %v1607_v3  ;;  %v1033_v23 = vsub.f32 %v2254_v27, %v991_v34 }
 0x274   : > { %v1609_v58 = vpop.eup %1608  ;;  %1622 = vlog2.f32 %v916_v4  ;;  %v885_v44 = vpop.xlane.xlu1 %884  ;;  %v1016_v32 = vsub.f32 %v2255_v14, %v957_v50 }
 0x275   : > { %v1611_v22 = vpop.eup %1610  ;;  %v989_v61 = vmul.f32 0.6931472, %v1609_v58  ;;  %v932_v2 = vsub.f32 %v885_v44, %v2253_v31  ;;  %1098 = vmax.xlane.f32.xlu0 %v1071_v53  ;;  %1088 = vmax.xlane.f32.xlu1 %v1066_v12  ;;  %v1017_v1 = vsub.f32 %v2257_v21, %v959_v26  ;;  %v1123_v58 = vld [vmem:[%s2210_s2 + $0x78] sm:$0xff]  ;;  %v1122_v44 = vld [vmem:[%s2210_s2 + $0x70] sm:$0xff] }
 0x276   : > { %v955_v13 = vmul.f32 0.6931472, %v1611_v22 }
 0x277   : > { %1624 = vlog2.f32 %v932_v2  ;;  %v1032_v41 = vsub.f32 %v2256_v46, %v989_v61  ;;  %v1049_v8 = vsub.f32 %v1017_v1, %v1033_v23  ;;  %v1121_v61 = vld [vmem:[%s2210_s2 + $0x68] sm:$0xff]  ;;  %v1120_v2 = vld [vmem:[%s2210_s2 + $0x60] sm:$0xff]  ;;  %v1119_v23 = vld [vmem:[%s2210_s2 + $0x58] sm:$0xff] }
 0x278   : > { %v1613_v47 = vpop.eup %1612  ;;  %v1015_v42 = vsub.f32 %v2259_v10, %v955_v13  ;;  %v1117_v13 = vld [vmem:[%s2210_s2 + $0x48] sm:$0xff]  ;;  %v1115_v1 = vld [vmem:[%s2210_s2 + $0x38] sm:$0xff]  ;;  %v1112_v10 = vld [vmem:[%s2210_s2 + $0x20] sm:$0xff] }
 0x279   : > { %v1615_v60 = vpop.eup %1614  ;;  %v987_v43 = vmul.f32 0.6931472, %v1613_v47  ;;  %1094 = vmax.xlane.f32.xlu0 %v1069_v40  ;;  %v1048_v57 = vsub.f32 %v1016_v32, %v1032_v41  ;;  %v1065_v51 = vand.u32 2147483647, %v1049_v8  ;;  %v1118_v32 = vld [vmem:[%s2210_s2 + $0x50] sm:$0xff] }
 0x27a   : > { %v953_v59 = vmul.f32 0.6931472, %v1615_v60 }
 0x27b   : > { %v1064_v49 = vand.u32 2147483647, %v1048_v57  ;;  %v1031_v0 = vsub.f32 %v2258_v28, %v987_v43  ;;  %v1116_v43 = vld [vmem:[%s2210_s2 + $0x40] sm:$0xff] }
 0x27c   : > { %v1617_v9 = vpop.eup %1616  ;;  %v1014_v24 = vsub.f32 %v2260_v25, %v953_v59  ;;  %v1114_v59 = vld [vmem:[%s2210_s2 + $0x30] sm:$0xff] }
 0x27d   : > { %v1619_v38 = vpop.eup %1618  ;;  %v985_v11 = vmul.f32 0.6931472, %v1617_v9  ;;  %1090 = vmax.xlane.f32.xlu0 %v1067_v15  ;;  %1084 = vmax.xlane.f32.xlu1 %v1064_v49  ;;  %v1047_v29 = vsub.f32 %v1015_v42, %v1031_v0  ;;  %v1113_v0 = vld [vmem:[%s2210_s2 + $0x28] sm:$0xff] }
 0x27e   : > { %v951_v18 = vmul.f32 0.6931472, %v1619_v38 }
 0x27f   : > { %v1030_v5 = vsub.f32 %v2261_v48, %v985_v11  ;;  %v1063_v54 = vand.u32 2147483647, %v1047_v29  ;;  %v1111_v29 = vld [vmem:[%s2210_s2 + $0x18] sm:$0xff] }
 0x280   : > { %v1621_v19 = vpop.eup %1620  ;;  %v1013_v63 = vsub.f32 %v2262_v56, %v951_v18 }
 0x281   : > { %v1623_v62 = vpop.eup %1622  ;;  %v983_v17 = vmul.f32 0.6931472, %v1621_v19  ;;  %1086 = vmax.xlane.f32.xlu0 %v1065_v51  ;;  %v1046_v16 = vsub.f32 %v1014_v24, %v1030_v5  ;;  %v1110_v51 = vld [vmem:[%s2210_s2 + $0x10] sm:$0xff]  ;;  %v1109_v5 = vld [vmem:[%s2210_s2 + $0x8] sm:$0xff] }
 0x282   : > { %v949_v7 = vmul.f32 0.6931472, %v1623_v62 }
 0x283   : > { %v1062_v30 = vand.u32 2147483647, %v1046_v16  ;;  %v1029_v39 = vsub.f32 %v2263_v36, %v983_v17  ;;  %v1108_v16 = vld [vmem:[%s2210_s2] sm:$0xff] }
 0x284   : > { %v1625_v33 = vpop.eup %1624  ;;  %v1012_v4 = vsub.f32 %v2264_v37, %v949_v7 }
 0x285   : > { %v981_v35 = vmul.f32 0.6931472, %v1625_v33  ;;  %1082 = vmax.xlane.f32.xlu0 %v1063_v54  ;;  %1080 = vmax.xlane.f32.xlu1 %v1062_v30  ;;  %v1045_v3 = vsub.f32 %v1013_v63, %v1029_v39  ;;  %v1652_v30 = vmov 1.0  }
 0x287   : > { %v1061_v34 = vand.u32 2147483647, %v1045_v3  ;;  %v1028_v6 = vsub.f32 %v2265_v20, %v981_v35 }
 0x289   : > { %1078 = vmax.xlane.f32.xlu0 %v1061_v34  ;;  %v1044_v45 = vsub.f32 %v1012_v4, %v1028_v6 }
 0x28b   : > { %v1060_v50 = vand.u32 2147483647, %v1044_v45 }
 0x28d   : > { %1076 = vmax.xlane.f32.xlu1 %v1060_v50 }
 0x2ee   : > { %v1105_v53 = vpop.xlane.xlu1 %1104 }
 0x2ef   : > { %v1138_v31 = vmul.f32 %v1122_v44, %v1105_v53 }
 0x2f2   : > { %v1101_v12 = vpop.xlane.xlu1 %1100 }
 0x2f3   : > { %v1136_v14 = vmul.f32 %v1120_v2, %v1101_v12 }
 0x2f6   : > { %v1107_v22 = vpop.xlane.xlu0 %1106  ;;  %v1097_v40 = vpop.xlane.xlu1 %1096 }
 0x2f7   : > { %v1139_v26 = vmul.f32 %v1123_v58, %v1107_v22  ;;  %v1134_v60 = vmul.f32 %v1118_v32, %v1097_v40 }
 0x2f9   : > { %1397 = vmatpush3.msra.mxu1 %v1139_v26 }
 0x2fa   : > { %1398 = vmatprep.subr.mxu1 %v1650_v55  ;;  %v1103_v52 = vpop.xlane.xlu0 %1102  ;;  %v1093_v47 = vpop.xlane.xlu1 %1092 }
 0x2fb   : > { %v1137_v27 = vmul.f32 %v1121_v61, %v1103_v52  ;;  %1399 = vmatpush3.msra.mxu1 %v1138_v31  ;;  %v1132_v15 = vmul.f32 %v1116_v43, %v1093_v47 }
 0x2fc   : > { %1400 = vmatprep.subr.mxu1 %v1650_v55 }
 0x2fd   : > { %1401 = vmatpush3.msra.mxu1 %v1137_v27 }
 0x2fe   : > { %1402 = vmatprep.subr.mxu1 %v1650_v55  ;;  %v1099_v46 = vpop.xlane.xlu0 %1098  ;;  %v1089_v49 = vpop.xlane.xlu1 %1088 }
 0x2ff   : > { %v1135_v41 = vmul.f32 %v1119_v23, %v1099_v46  ;;  %1403 = vmatpush3.msra.mxu1 %v1136_v14  ;;  %v1130_v9 = vmul.f32 %v1114_v59, %v1089_v49 }
 0x300   : > { %1404 = vmatprep.subr.mxu1 %v1650_v55 }
 0x301   : > { %1405 = vmatpush3.msra.mxu1 %v1135_v41 }
 0x302   : > { %1406 = vmatprep.subr.mxu1 %v1650_v55  ;;  %v1095_v57 = vpop.xlane.xlu0 %1094 }
 0x303   : > { %v1133_v21 = vmul.f32 %v1117_v13, %v1095_v57  ;;  %1407 = vmatpush3.msra.mxu1 %v1134_v60 }
 0x304   : > { %1408 = vmatprep.subr.mxu1 %v1650_v55 }
 0x305   : > { %1409 = vmatpush3.msra.mxu1 %v1133_v21 }
 0x306   : > { %1410 = vmatprep.subr.mxu1 %v1650_v55  ;;  %v1091_v8 = vpop.xlane.xlu0 %1090  ;;  %v1085_v42 = vpop.xlane.xlu1 %1084 }
 0x307   : > { %v1131_v28 = vmul.f32 %v1115_v1, %v1091_v8  ;;  %1411 = vmatpush3.msra.mxu1 %v1132_v15  ;;  %v1128_v18 = vmul.f32 %v1112_v10, %v1085_v42 }
 0x308   : > { %1412 = vmatprep.subr.mxu1 %v1650_v55 }
 0x309   : > { %1413 = vmatpush3.msra.mxu1 %v1131_v28 }
 0x30a   : > { %1414 = vmatprep.subr.mxu1 %v1650_v55  ;;  %v1087_v38 = vpop.xlane.xlu0 %1086 }
 0x30b   : > { %v1129_v11 = vmul.f32 %v1113_v0, %v1087_v38  ;;  %1415 = vmatpush3.msra.mxu1 %v1130_v9 }
 0x30c   : > { %1416 = vmatprep.subr.mxu1 %v1650_v55 }
 0x30d   : > { %1417 = vmatpush3.msra.mxu1 %v1129_v11 }
 0x30e   : > { %v1081_v25 = vpop.xlane.xlu1 %1080  ;;  %1418 = vmatprep.subr.mxu1 %v1650_v55  ;;  %v1083_v24 = vpop.xlane.xlu0 %1082 }
 0x30f   : > { %v1127_v48 = vmul.f32 %v1111_v29, %v1083_v24  ;;  %1419 = vmatpush3.msra.mxu1 %v1128_v18  ;;  %v1126_v19 = vmul.f32 %v1110_v51, %v1081_v25 }
 0x310   : > { %1420 = vmatprep.subr.mxu1 %v1650_v55 }
 0x311   : > { %1421 = vmatpush3.msra.mxu1 %v1127_v48 }
 0x312   : > { %1422 = vmatprep.subr.mxu1 %v1650_v55  ;;  %v1079_v62 = vpop.xlane.xlu0 %1078 }
 0x313   : > { %v1125_v17 = vmul.f32 %v1109_v5, %v1079_v62  ;;  %1423 = vmatpush3.msra.mxu1 %v1126_v19 }
 0x314   : > { %1424 = vmatprep.subr.mxu1 %v1650_v55 }
 0x315   : > { %1425 = vmatpush3.msra.mxu1 %v1125_v17 }
 0x316   : > { %v1077_v54 = vpop.xlane.xlu1 %1076  ;;  %1426 = vmatprep.subr.mxu1 %v1650_v55 }
 0x317   : > { %v1124_v7 = vmul.f32 %v1108_v16, %v1077_v54 }
 0x319   : > { %1427 = vmatpush3.msra.mxu1 %v1124_v7 }
 0x31a   : > { %1429 = vmatmul.mubr.f32.vlgmr.msra.gmra.mxu1 %v1652_v30 }
 0x3da   : > { %v1206_v56 = vpop.f32.mrf.mxu1 }
 0x3db   : > { %1210 = vst [vmem:[%s337_s10] sm:$0xff] %v1206_v56 }
 0x3dc   : > { %v1430_v63 = vpop.f32.mrf.mxu1 }
 0x3dd PF: > { %p10_p9 = scmp.ge.s32.totalorder %s1690_s16, 4   ;;  %s2266_s12 = smov %s1644_s13 }
 0x3de   : > { %s2267_s13 = smov %s1699_s19  ;;  %s2268_s14 = smov %s1690_s16 }
 0x3df   :  { %12 = sbr.rel (!%p10_p9) target bundleno = 2 (0x2), region = 108 }

</bundles_post_ra>
